<compile_context>
chip_gen: v7x
topology: tpu7x:2x2x1
jax: 0.10.0
libtpu: 0.0.40
codegen_flags: <defaults>
</compile_context>

<pallas_src>
import functools

import jax
import jax.numpy as jnp
from jax.experimental import pallas as pl
from jax.experimental.pallas import tpu as pltpu

SMOOTH = 1.0   # BinaryDiceLoss(smooth=1)
P_POW = 2      # BinaryDiceLoss(p=2): denominator uses x*x


def _dice_partial_kernel(pred_ref, targ_ref, num_ref, den_ref, *,
                         valid_last_cols, block_d):
    # pred_ref / targ_ref: (TR, TD) VMEM blocks of the (R, D) inputs.
    # num_ref / den_ref:   (TR, 1) f32 per-row partial sums; their block index is
    #                      constant along the reduction axis, so they stay resident in
    #                      VMEM and are written back to HBM once per row tile.
    k = pl.program_id(1)
    nk = pl.num_programs(1)

    @pl.when(k == 0)
    def _():
        num_ref[...] = jnp.zeros_like(num_ref)
        den_ref[...] = jnp.zeros_like(den_ref)

    p = pred_ref[...].astype(jnp.float32)
    t = targ_ref[...].astype(jnp.float32)

    if valid_last_cols != block_d:
        # Ragged last reduction block: the clipped input DMA leaves garbage past
        # column D, zero it so it contributes nothing to the sums.  Static python
        # branch -> this code only exists when the shape actually needs it.
        col = jax.lax.broadcasted_iota(jnp.int32, p.shape, dimension=1)
        limit = jnp.where(k == nk - 1, valid_last_cols, block_d)
        valid = col < limit
        p = jnp.where(valid, p, 0.0)
        t = jnp.where(valid, t, 0.0)

    # BinaryDiceLoss reductions (p=2): sum_d(p*t), sum_d(p^2 + t^2)
    num_ref[...] += jnp.sum(p * t, axis=-1, keepdims=True)
    den_ref[...] += jnp.sum(p * p + t * t, axis=-1, keepdims=True)


def dice_loss(predict, target, weight=None, ignore_index=None):
    """predict, target: [N, C, *spatial].  Same semantics as the PyTorch DiceLoss
    (BinaryDiceLoss with smooth=1, p=2, reduction='mean'); weight / ignore_index are
    applied in the tiny JAX epilogue."""
    assert predict.shape == target.shape, "predict & target shape do not match"
    N, C = predict.shape[0], predict.shape[1]
    D = 1
    for s in predict.shape[2:]:
        D *= s
    R = N * C

    # Free views: [N, C, *spatial] -> (N*C, prod(spatial)); row r == (n*C + c).
    p2 = predict.reshape(R, D)
    t2 = target.reshape(R, D)

    # Tile selection.
    MAX_BLOCK_ELEMS = 512 * 1024                      # ~2 MiB of f32 per input block
    if D <= 128:
        TD = D                                        # full-dim block (always legal)
    else:
        TD = min(8192, (D // 128) * 128)              # lane-aligned, never > D
    if R <= 8:
        TR = R                                        # full-dim block (always legal)
    else:
        max_tr = max(8, (MAX_BLOCK_ELEMS // TD) // 8 * 8)
        TR = min((R // 8) * 8, max_tr, 1024)

    grid_r = (R + TR - 1) // TR
    grid_d = (D + TD - 1) // TD
    valid_last_cols = D - (grid_d - 1) * TD           # in (0, TD]

    itemsize = jnp.dtype(p2.dtype).itemsize
    cost = pl.CostEstimate(
        flops=5 * R * D,
        transcendentals=0,
        bytes_accessed=2 * R * D * itemsize + 2 * R * 4,
    )

    kernel = functools.partial(
        _dice_partial_kernel, valid_last_cols=valid_last_cols, block_d=TD)

    num, den = pl.pallas_call(
        kernel,
        out_shape=(
            jax.ShapeDtypeStruct((R, 1), jnp.float32),
            jax.ShapeDtypeStruct((R, 1), jnp.float32),
        ),
        grid_spec=pltpu.PrefetchScalarGridSpec(
            num_scalar_prefetch=0,
            grid=(grid_r, grid_d),
            in_specs=[
                pl.BlockSpec((TR, TD), lambda r, k: (r, k)),
                pl.BlockSpec((TR, TD), lambda r, k: (r, k)),
            ],
            out_specs=(
                pl.BlockSpec((TR, 1), lambda r, k: (r, 0)),
                pl.BlockSpec((TR, 1), lambda r, k: (r, 0)),
            ),
        ),
        compiler_params=pltpu.CompilerParams(
            dimension_semantics=("parallel", "arbitrary"),
            vmem_limit_bytes=32 * 1024 * 1024,
        ),
        cost_estimate=cost,
    )(p2, t2)

    # Tiny (N*C,)-sized epilogue in plain JAX (keeps the row grid axis 'parallel').
    num_r = num[:, 0] + SMOOTH
    den_r = den[:, 0] + SMOOTH
    loss_rows = (1.0 - num_r / den_r).reshape(N, C)   # per-(batch, class) binary dice
    per_class = jnp.mean(loss_rows, axis=0)           # BinaryDiceLoss reduction='mean'
    if weight is not None:
        per_class = per_class * jnp.asarray(weight, jnp.float32).reshape(C)
    if ignore_index is not None:
        per_class = jnp.where(jnp.arange(C) == ignore_index, 0.0, per_class)
    return jnp.sum(per_class) / jnp.float32(C)


def _dice_loss_ref(predict, target):
    """Pure-JAX reference mirroring the PyTorch forward exactly (defaults)."""
    N, C = predict.shape[0], predict.shape[1]
    pr = predict.reshape(N, C, -1).astype(jnp.float32)
    tg = target.reshape(N, C, -1).astype(jnp.float32)
    total = jnp.float32(0.0)
    for i in range(C):
        p_i, t_i = pr[:, i], tg[:, i]
        num = jnp.sum(p_i * t_i, axis=1) + SMOOTH
        den = jnp.sum(p_i**P_POW + t_i**P_POW, axis=1) + SMOOTH
        total = total + jnp.mean(1.0 - num / den)
    return total / C


if __name__ == "__main__":
    key = jax.random.PRNGKey(0)
    k1, k2, k3, k4 = jax.random.split(key, 4)

    # Case 1: aligned shapes (the module's canonical NCHW use).
    N, C, H, W = 2, 4, 16, 16
    predict = jax.nn.softmax(jax.random.normal(k1, (N, C, H, W), jnp.float32), axis=1)
    target_idx = jax.random.randint(k2, (N, H, W), 0, C)
    target = jax.nn.one_hot(target_idx, C, axis=1).astype(jnp.float32)  # [N, C, H, W]

    loss = jax.jit(dice_loss)(predict, target)
    jax.block_until_ready(loss)
    ref = _dice_loss_ref(predict, target)
    assert jnp.allclose(loss, ref, atol=1e-5, rtol=1e-5), (loss, ref)

    # Case 2: unaligned spatial size (exercises edge-block clipping + in-kernel mask).
    N2, C2, H2, W2 = 2, 3, 13, 13
    predict2 = jax.nn.softmax(jax.random.normal(k3, (N2, C2, H2, W2), jnp.float32), axis=1)
    target2 = jax.nn.one_hot(jax.random.randint(k4, (N2, H2, W2), 0, C2), C2,
                             axis=1).astype(jnp.float32)
    loss2 = jax.jit(dice_loss)(predict2, target2)
    jax.block_until_ready(loss2)
    ref2 = _dice_loss_ref(predict2, target2)
    assert jnp.allclose(loss2, ref2, atol=1e-5, rtol=1e-5), (loss2, ref2)

    print("KERNEL_OK")
</pallas_src>

<mosaic_0001>
module attributes {stable_mosaic.version = 11 : i64} {
  func.func @_dice_partial_kernel(%arg0: i32, %arg1: i32, %arg2: memref<8x256xf32, #tpu.memory_space<vmem>>, %arg3: memref<8x256xf32, #tpu.memory_space<vmem>>, %arg4: memref<8x1xf32, #tpu.memory_space<vmem>>, %arg5: memref<8x1xf32, #tpu.memory_space<vmem>>) attributes {dimension_semantics = [#tpu.dimension_semantics<parallel>, #tpu.dimension_semantics<arbitrary>], iteration_bounds = array<i64: 1, 1>, scalar_prefetch = 0 : i64, scratch_operands = 0 : i64, tpu.core_type = #tpu.core_type<tc>, window_params = [{transform_indices = @transform_0, window_bounds = array<i64: 8, 256>}, {transform_indices = @transform_1, window_bounds = array<i64: 8, 256>}, {transform_indices = @transform_2, window_bounds = array<i64: 8, 1>}, {transform_indices = @transform_3, window_bounds = array<i64: 8, 1>}]} {
    %c0_i32 = arith.constant 0 : i32
    %0 = arith.cmpi eq, %arg1, %c0_i32 : i32
    %1 = arith.extui %0 : i1 to i32
    %c0_i32_0 = arith.constant 0 : i32
    %2 = arith.cmpi ne, %1, %c0_i32_0 : i32
    scf.if %2 {
      %cst_13 = arith.constant 0.000000e+00 : f32
      %19 = vector.broadcast %cst_13 : f32 to vector<8x1xf32>
      %c0_14 = arith.constant 0 : index
      %c0_15 = arith.constant 0 : index
      %20 = vector.load %arg4[%c0_14, %c0_15] : memref<8x1xf32, #tpu.memory_space<vmem>>, vector<8x1xf32>
      tpu.vector_store %arg4[%c0_14, %c0_15], %19 {strides = array<i32>} : memref<8x1xf32, #tpu.memory_space<vmem>>, vector<8x1xf32>,
      %cst_16 = arith.constant 0.000000e+00 : f32
      %21 = vector.broadcast %cst_16 : f32 to vector<8x1xf32>
      %c0_17 = arith.constant 0 : index
      %c0_18 = arith.constant 0 : index
      %22 = vector.load %arg5[%c0_17, %c0_18] : memref<8x1xf32, #tpu.memory_space<vmem>>, vector<8x1xf32>
      tpu.vector_store %arg5[%c0_17, %c0_18], %21 {strides = array<i32>} : memref<8x1xf32, #tpu.memory_space<vmem>>, vector<8x1xf32>,
    } else {
    }
    %c0 = arith.constant 0 : index
    %c0_1 = arith.constant 0 : index
    %3 = vector.load %arg2[%c0, %c0_1] : memref<8x256xf32, #tpu.memory_space<vmem>>, vector<8x256xf32>
    %c0_2 = arith.constant 0 : index
    %c0_3 = arith.constant 0 : index
    %4 = vector.load %arg3[%c0_2, %c0_3] : memref<8x256xf32, #tpu.memory_space<vmem>>, vector<8x256xf32>
    %c0_4 = arith.constant 0 : index
    %c0_5 = arith.constant 0 : index
    %5 = vector.load %arg4[%c0_4, %c0_5] : memref<8x1xf32, #tpu.memory_space<vmem>>, vector<8x1xf32>
    %6 = arith.mulf %3, %4 : vector<8x256xf32>
    %cst = arith.constant dense<0.000000e+00> : vector<8xf32>
    %7 = vector.multi_reduction <add>, %6, %cst [1] : vector<8x256xf32> to vector<8xf32>
    %8 = vector.shape_cast %7 : vector<8xf32> to vector<8x1xf32>
    %9 = arith.addf %5, %8 : vector<8x1xf32>
    %c0_6 = arith.constant 0 : index
    %c0_7 = arith.constant 0 : index
    %10 = vector.load %arg4[%c0_6, %c0_7] : memref<8x1xf32, #tpu.memory_space<vmem>>, vector<8x1xf32>
    tpu.vector_store %arg4[%c0_6, %c0_7], %9 {strides = array<i32>} : memref<8x1xf32, #tpu.memory_space<vmem>>, vector<8x1xf32>,
    %c0_8 = arith.constant 0 : index
    %c0_9 = arith.constant 0 : index
    %11 = vector.load %arg5[%c0_8, %c0_9] : memref<8x1xf32, #tpu.memory_space<vmem>>, vector<8x1xf32>
    %12 = arith.mulf %3, %3 : vector<8x256xf32>
    %13 = arith.mulf %4, %4 : vector<8x256xf32>
    %14 = arith.addf %12, %13 : vector<8x256xf32>
    %cst_10 = arith.constant dense<0.000000e+00> : vector<8xf32>
    %15 = vector.multi_reduction <add>, %14, %cst_10 [1] : vector<8x256xf32> to vector<8xf32>
    %16 = vector.shape_cast %15 : vector<8xf32> to vector<8x1xf32>
    %17 = arith.addf %11, %16 : vector<8x1xf32>
    %c0_11 = arith.constant 0 : index
    %c0_12 = arith.constant 0 : index
    %18 = vector.load %arg5[%c0_11, %c0_12] : memref<8x1xf32, #tpu.memory_space<vmem>>, vector<8x1xf32>
    tpu.vector_store %arg5[%c0_11, %c0_12], %17 {strides = array<i32>} : memref<8x1xf32, #tpu.memory_space<vmem>>, vector<8x1xf32>,
    return
  }
  func.func @transform_0(%arg0: i32, %arg1: i32) -> (i32, i32) {
    %c0_i32 = arith.constant 0 : i32
    return %arg0, %arg1 : i32, i32
  }
  func.func @transform_1(%arg0: i32, %arg1: i32) -> (i32, i32) {
    %c0_i32 = arith.constant 0 : i32
    return %arg0, %arg1 : i32, i32
  }
  func.func @transform_2(%arg0: i32, %arg1: i32) -> (i32, i32) {
    %c0_i32 = arith.constant 0 : i32
    %c0_i32_0 = arith.constant 0 : i32
    return %arg0, %c0_i32 : i32, i32
  }
  func.func @transform_3(%arg0: i32, %arg1: i32) -> (i32, i32) {
    %c0_i32 = arith.constant 0 : i32
    %c0_i32_0 = arith.constant 0 : i32
    return %arg0, %c0_i32 : i32, i32
  }
}

</mosaic_0001>

<bundles_post_ra>
// kernel: dice_loss.1
= control target key start
LH: loop header
LB: loop body
LE: loop exit
PB: predicated region body
PF: predicated region fallthrough
CT: control target
= control target key end

     0   :  { %vm17_vm0 = vcmask 7168   ;;  %v54_v3 = vmov 0.0   ;;  %s109_s0 = inlined_call_operand.vmem [shape: f32[8,256], index: 0, kind: input, shape index: {}]   ;;  %s110_s1 = inlined_call_operand.vmem [shape: f32[8,256], index: 1, kind: input, shape index: {}]   ;;  %s111_s2 = inlined_call_operand.vmem [shape: f32[8,1], index: 2, kind: output, shape index: {0}]   ;;  %s112_s3 = inlined_call_operand.vmem [shape: f32[8,1], index: 3, kind: output, shape index: {1}]  }
   0x1   :  { %v20_v0 = vld [vmem:[%s109_s0] sm:$0xff]  ;;  %v21_v1 = vld [vmem:[%s109_s0 + $0x8] sm:$0xff]  ;;  %18 = vst.msk [vmem:[%s111_s2] sm:$0xff] %vm17_vm0, %v54_v3  ;;  %19 = vst.msk [vmem:[%s112_s3] sm:$0xff] %vm17_vm0, %v54_v3 }
   0x2   :  { %v22_v2 = vld [vmem:[%s110_s1] sm:$0xff]  ;;  %v23_v4 = vld [vmem:[%s110_s1 + $0x8] sm:$0xff]  ;;  %v34_v6 = vmul.f32 %v20_v0, %v20_v0  ;;  %v35_v7 = vmul.f32 %v21_v1, %v21_v1 }
   0x3   :  { %v25_v5 = vmul.f32 %v22_v2, %v20_v0  ;;  %v36_v8 = vmul.f32 %v22_v2, %v22_v2  ;;  %v26_v9 = vmul.f32 %v23_v4, %v21_v1  ;;  %v37_v10 = vmul.f32 %v23_v4, %v23_v4 }
   0x5   :  { %v38_v11 = vadd.f32 %v36_v8, %v34_v6  ;;  %v27_v12 = vadd.f32 %v26_v9, %v25_v5  ;;  %v39_v13 = vadd.f32 %v37_v10, %v35_v7 }
   0x7   :  { %28 = vadd.xlane.f32.xlu0 %v27_v12  ;;  %v40_v14 = vadd.f32 %v39_v13, %v38_v11 }
   0x8   :  { %v24_v15 = vld [vmem:[%s111_s2] sm:$0xff] }
   0x9   :  { %v33_v18 = vld [vmem:[%s112_s3] sm:$0xff] }
   0xb   :  { %41 = vadd.xlane.f32.xlu0 %v40_v14 }
  0x94   :  { %v29_v16 = vpop.xlane.xlu0 %28 }
  0x95   :  { %v30_v17 = vadd.f32 %v29_v16, %v24_v15 }
  0x97   :  { %32 = vst.msk [vmem:[%s111_s2] sm:$0xff] %vm17_vm0, %v30_v17 }
  0x98   :  { %v42_v19 = vpop.xlane.xlu0 %41 }
  0x99   :  { %v43_v20 = vadd.f32 %v42_v19, %v33_v18 }
  0x9b   :  { %44 = vst.msk [vmem:[%s112_s3] sm:$0xff] %vm17_vm0, %v43_v20 }

</bundles_post_ra>
